<compile_context>
chip_gen: v7x
topology: tpu7x:2x2x1
jax: 0.10.0
libtpu: 0.0.40
codegen_flags: <defaults>
</compile_context>

<pallas_src>
import functools

import jax
import jax.numpy as jnp
from jax.experimental import pallas as pl
from jax.experimental.pallas import tpu as pltpu

# Lane-dense width for the fused head output (mu in col 0, log_std in col 1).
_HEAD_LANES = 128


def _round_up(x, m):
    return (x + m - 1) // m * m


def actor_kernel(x_ref, w1_ref, b1_ref, w2_ref, b2_ref, wh_ref, bh_ref,
                 out_ref, *, reparam_noise, max_log_std):
    x = x_ref[...]

    # fc1 + relu
    h1 = jnp.dot(x, w1_ref[...], preferred_element_type=jnp.float32) + b1_ref[...]
    h1 = jnp.maximum(h1, 0.0)

    # fc2 + relu
    h2 = jnp.dot(h1, w2_ref[...], preferred_element_type=jnp.float32) + b2_ref[...]
    h2 = jnp.maximum(h2, 0.0)

    # Fused heads: single matmul producing [mu | log_std | 0 ... 0] columns.
    heads = jnp.dot(h2, wh_ref[...], preferred_element_type=jnp.float32) + bh_ref[...]

    # Clamp only the log_std column (lane index 1) via a lane-wise select;
    # columns 0 (mu) and 2.. (zero padding) pass through untouched.
    col = jax.lax.broadcasted_iota(jnp.int32, heads.shape, 1)
    clamped = jnp.clip(heads, reparam_noise, max_log_std)
    out = jnp.where(col == 1, clamped, heads)

    out_ref[...] = out.astype(out_ref.dtype)


def actor_forward(x, params, *, reparam_noise=1e-6, max_log_std=2.0, block_b=256):
    """Runs the Actor forward pass in a single Pallas kernel.

    x: (B, state_dim) float32
    params: dict with w1 (S,H), b1 (1,H), w2 (H,H), b2 (1,H),
            wmu (H,1), bmu (1,1), wls (H,1), bls (1,1)
    returns: (mu (B,1), log_std (B,1))
    """
    B, S = x.shape
    H = params["w1"].shape[1]

    # Fuse the two heads into one weight / bias, zero-padded to 128 lanes so
    # the kernel's output tile is lane-dense (unmasked stores).
    w_head = jnp.concatenate([params["wmu"], params["wls"]], axis=1)      # (H, 2)
    b_head = jnp.concatenate([params["bmu"], params["bls"]], axis=1)      # (1, 2)
    w_head = jnp.pad(w_head, ((0, 0), (0, _HEAD_LANES - 2)))              # (H, 128)
    b_head = jnp.pad(b_head, ((0, 0), (0, _HEAD_LANES - 2)))              # (1, 128)

    # Batch tiling: TB multiple of 8 (sublane tiling), pad batch to a multiple
    # of TB so every grid step sees a full block.
    TB = min(block_b, _round_up(B, 8))
    B_pad = _round_up(B, TB)
    x_in = x if B_pad == B else jnp.pad(x, ((0, B_pad - B), (0, 0)))

    grid = (B_pad // TB,)

    kernel = functools.partial(actor_kernel,
                               reparam_noise=reparam_noise,
                               max_log_std=max_log_std)

    itemsize = 4  # f32
    flops = 2 * B_pad * (S * H + H * H + H * _HEAD_LANES)
    bytes_accessed = itemsize * (B_pad * S + S * H + H + H * H + H
                                 + H * _HEAD_LANES + _HEAD_LANES
                                 + B_pad * _HEAD_LANES)
    cost = pl.CostEstimate(flops=flops, transcendentals=0,
                           bytes_accessed=bytes_accessed)

    heads = pl.pallas_call(
        kernel,
        out_shape=jax.ShapeDtypeStruct((B_pad, _HEAD_LANES), jnp.float32),
        grid=grid,
        in_specs=[
            pl.BlockSpec((TB, S), lambda i: (i, 0)),           # x: tiled on batch
            pl.BlockSpec((S, H), lambda i: (0, 0)),            # w1: resident
            pl.BlockSpec((1, H), lambda i: (0, 0)),            # b1: resident
            pl.BlockSpec((H, H), lambda i: (0, 0)),            # w2: resident
            pl.BlockSpec((1, H), lambda i: (0, 0)),            # b2: resident
            pl.BlockSpec((H, _HEAD_LANES), lambda i: (0, 0)),  # fused head weight
            pl.BlockSpec((1, _HEAD_LANES), lambda i: (0, 0)),  # fused head bias
        ],
        out_specs=pl.BlockSpec((TB, _HEAD_LANES), lambda i: (i, 0)),
        compiler_params=pltpu.CompilerParams(
            dimension_semantics=("parallel",)),
        cost_estimate=cost,
    )(x_in, params["w1"], params["b1"], params["w2"], params["b2"],
      w_head, b_head)

    mu = heads[:B, 0:1]
    log_std = heads[:B, 1:2]
    return mu, log_std


def init_actor_params(key, state_dim, hidden_dim):
    """Deterministic init matching PyTorch nn.Linear default:
    U(-1/sqrt(fan_in), 1/sqrt(fan_in)) for both weights and biases.
    Weights stored as (in, out)."""
    def linear(k, fan_in, fan_out):
        kw, kb = jax.random.split(k)
        bound = 1.0 / jnp.sqrt(jnp.float32(fan_in))
        w = jax.random.uniform(kw, (fan_in, fan_out), jnp.float32, -bound, bound)
        b = jax.random.uniform(kb, (1, fan_out), jnp.float32, -bound, bound)
        return w, b

    k1, k2, k3, k4 = jax.random.split(key, 4)
    w1, b1 = linear(k1, state_dim, hidden_dim)
    w2, b2 = linear(k2, hidden_dim, hidden_dim)
    wmu, bmu = linear(k3, hidden_dim, 1)
    wls, bls = linear(k4, hidden_dim, 1)
    return dict(w1=w1, b1=b1, w2=w2, b2=b2,
                wmu=wmu, bmu=bmu, wls=wls, bls=bls)


def actor_forward_ref(x, params, *, reparam_noise=1e-6, max_log_std=2.0):
    """Plain-JAX reference for verification."""
    h1 = jnp.maximum(x @ params["w1"] + params["b1"], 0.0)
    h2 = jnp.maximum(h1 @ params["w2"] + params["b2"], 0.0)
    mu = h2 @ params["wmu"] + params["bmu"]
    ls = jnp.clip(h2 @ params["wls"] + params["bls"], reparam_noise, max_log_std)
    return mu, ls


if __name__ == "__main__":
    # Small shapes consistent with the module's forward.
    batch = 8
    state_dim = 8
    hidden_dim = 32
    max_action = 1.0  # not used in forward()

    key = jax.random.PRNGKey(0)
    k_params, k_x = jax.random.split(key)

    params = init_actor_params(k_params, state_dim, hidden_dim)
    x = jax.random.normal(k_x, (batch, state_dim), dtype=jnp.float32)

    mu, log_std = actor_forward(x, params)
    mu = jax.block_until_ready(mu)
    log_std = jax.block_until_ready(log_std)

    # Verify against the pure-JAX reference.
    mu_ref, ls_ref = actor_forward_ref(x, params)
    assert mu.shape == (batch, 1) and log_std.shape == (batch, 1)
    assert jnp.allclose(mu, mu_ref, atol=1e-5, rtol=1e-5)
    assert jnp.allclose(log_std, ls_ref, atol=1e-5, rtol=1e-5)
    assert jnp.all(log_std >= 1e-6) and jnp.all(log_std <= 2.0)

    # Also sanity-check a larger (multi-tile, padded) batch exercises the grid path.
    xb = jax.random.normal(jax.random.PRNGKey(1), (300, state_dim), jnp.float32)
    mu_b, ls_b = actor_forward(xb, params, block_b=128)
    mu_b = jax.block_until_ready(mu_b)
    mu_b_ref, ls_b_ref = actor_forward_ref(xb, params)
    assert mu_b.shape == (300, 1) and ls_b.shape == (300, 1)
    assert jnp.allclose(mu_b, mu_b_ref, atol=1e-5, rtol=1e-5)
    assert jnp.allclose(ls_b, ls_b_ref, atol=1e-5, rtol=1e-5)

    print("KERNEL_OK")
</pallas_src>

<mosaic_0001>
module attributes {stable_mosaic.version = 11 : i64} {
  func.func @actor_kernel(%arg0: i32, %arg1: memref<8x8xf32, #tpu.memory_space<vmem>>, %arg2: memref<8x32xf32, #tpu.memory_space<vmem>>, %arg3: memref<1x32xf32, #tpu.memory_space<vmem>>, %arg4: memref<32x32xf32, #tpu.memory_space<vmem>>, %arg5: memref<1x32xf32, #tpu.memory_space<vmem>>, %arg6: memref<32x128xf32, #tpu.memory_space<vmem>>, %arg7: memref<1x128xf32, #tpu.memory_space<vmem>>, %arg8: memref<8x128xf32, #tpu.memory_space<vmem>>) attributes {dimension_semantics = [#tpu.dimension_semantics<parallel>], iteration_bounds = array<i64: 1>, scalar_prefetch = 0 : i64, scratch_operands = 0 : i64, tpu.core_type = #tpu.core_type<tc>, window_params = [{transform_indices = @transform_0, window_bounds = array<i64: 8, 8>}, {pipeline_mode = #tpu.pipeline_mode<synchronous>, transform_indices = @transform_1, window_bounds = array<i64: 8, 32>}, {pipeline_mode = #tpu.pipeline_mode<synchronous>, transform_indices = @transform_2, window_bounds = array<i64: 1, 32>}, {pipeline_mode = #tpu.pipeline_mode<synchronous>, transform_indices = @transform_3, window_bounds = array<i64: 32, 32>}, {pipeline_mode = #tpu.pipeline_mode<synchronous>, transform_indices = @transform_4, window_bounds = array<i64: 1, 32>}, {pipeline_mode = #tpu.pipeline_mode<synchronous>, transform_indices = @transform_5, window_bounds = array<i64: 32, 128>}, {pipeline_mode = #tpu.pipeline_mode<synchronous>, transform_indices = @transform_6, window_bounds = array<i64: 1, 128>}, {transform_indices = @transform_7, window_bounds = array<i64: 8, 128>}]} {
    %c0 = arith.constant 0 : index
    %c0_0 = arith.constant 0 : index
    %0 = vector.load %arg1[%c0, %c0_0] : memref<8x8xf32, #tpu.memory_space<vmem>>, vector<8x8xf32>
    %c0_1 = arith.constant 0 : index
    %c0_2 = arith.constant 0 : index
    %1 = vector.load %arg2[%c0_1, %c0_2] : memref<8x32xf32, #tpu.memory_space<vmem>>, vector<8x32xf32>
    %cst = arith.constant dense<0.000000e+00> : vector<8x32xf32>
    %2 = tpu.matmul %0, %1, %cst {dimension_numbers = #tpu.dot_dimension_numbers<[1], [0], [0], [1], [0, 0, 1, 1], [], []>} : vector<8x8xf32>, vector<8x32xf32>, vector<8x32xf32> -> vector<8x32xf32>
    %c0_3 = arith.constant 0 : index
    %c0_4 = arith.constant 0 : index
    %3 = vector.load %arg3[%c0_3, %c0_4] : memref<1x32xf32, #tpu.memory_space<vmem>>, vector<1x32xf32>
    %4 = vector.broadcast %3 : vector<1x32xf32> to vector<8x32xf32>
    %5 = arith.addf %2, %4 : vector<8x32xf32>
    %cst_5 = arith.constant 0.000000e+00 : f32
    %6 = vector.broadcast %cst_5 : f32 to vector<8x32xf32>
    %7 = arith.maximumf %5, %6 : vector<8x32xf32>
    %c0_6 = arith.constant 0 : index
    %c0_7 = arith.constant 0 : index
    %8 = vector.load %arg4[%c0_6, %c0_7] : memref<32x32xf32, #tpu.memory_space<vmem>>, vector<32x32xf32>
    %cst_8 = arith.constant dense<0.000000e+00> : vector<8x32xf32>
    %9 = tpu.matmul %7, %8, %cst_8 {dimension_numbers = #tpu.dot_dimension_numbers<[1], [0], [0], [1], [0, 0, 1, 1], [], []>} : vector<8x32xf32>, vector<32x32xf32>, vector<8x32xf32> -> vector<8x32xf32>
    %c0_9 = arith.constant 0 : index
    %c0_10 = arith.constant 0 : index
    %10 = vector.load %arg5[%c0_9, %c0_10] : memref<1x32xf32, #tpu.memory_space<vmem>>, vector<1x32xf32>
    %11 = vector.broadcast %10 : vector<1x32xf32> to vector<8x32xf32>
    %12 = arith.addf %9, %11 : vector<8x32xf32>
    %cst_11 = arith.constant 0.000000e+00 : f32
    %13 = vector.broadcast %cst_11 : f32 to vector<8x32xf32>
    %14 = arith.maximumf %12, %13 : vector<8x32xf32>
    %c0_12 = arith.constant 0 : index
    %c0_13 = arith.constant 0 : index
    %15 = vector.load %arg6[%c0_12, %c0_13] : memref<32x128xf32, #tpu.memory_space<vmem>>, vector<32x128xf32>
    %cst_14 = arith.constant dense<0.000000e+00> : vector<8x128xf32>
    %16 = tpu.matmul %14, %15, %cst_14 {dimension_numbers = #tpu.dot_dimension_numbers<[1], [0], [0], [1], [0, 0, 1, 1], [], []>} : vector<8x32xf32>, vector<32x128xf32>, vector<8x128xf32> -> vector<8x128xf32>
    %c0_15 = arith.constant 0 : index
    %c0_16 = arith.constant 0 : index
    %17 = vector.load %arg7[%c0_15, %c0_16] : memref<1x128xf32, #tpu.memory_space<vmem>>, vector<1x128xf32>
    %18 = vector.broadcast %17 : vector<1x128xf32> to vector<8x128xf32>
    %19 = arith.addf %16, %18 : vector<8x128xf32>
    %20 = tpu.iota {dimensions = array<i32: 1>} : vector<8x128xi32>
    %cst_17 = arith.constant 9.99999997E-7 : f32
    %cst_18 = arith.constant 2.000000e+00 : f32
    %21 = vector.broadcast %cst_17 : f32 to vector<8x128xf32>
    %22 = arith.maximumf %21, %19 : vector<8x128xf32>
    %23 = vector.broadcast %cst_18 : f32 to vector<8x128xf32>
    %24 = arith.minimumf %23, %22 : vector<8x128xf32>
    %c1_i32 = arith.constant 1 : i32
    %25 = vector.broadcast %c1_i32 : i32 to vector<8x128xi32>
    %26 = arith.cmpi eq, %20, %25 : vector<8x128xi32>
    %27 = arith.select %26, %24, %19 : vector<8x128xi1>, vector<8x128xf32>
    %c0_19 = arith.constant 0 : index
    %c0_20 = arith.constant 0 : index
    %28 = vector.load %arg8[%c0_19, %c0_20] : memref<8x128xf32, #tpu.memory_space<vmem>>, vector<8x128xf32>
    tpu.vector_store %arg8[%c0_19, %c0_20], %27 {strides = array<i32>} : memref<8x128xf32, #tpu.memory_space<vmem>>, vector<8x128xf32>,
    return
  }
  func.func @transform_0(%arg0: i32) -> (i32, i32) {
    %c0_i32 = arith.constant 0 : i32
    %c0_i32_0 = arith.constant 0 : i32
    return %arg0, %c0_i32 : i32, i32
  }
  func.func @transform_1(%arg0: i32) -> (i32, i32) {
    %c0_i32 = arith.constant 0 : i32
    %c0_i32_0 = arith.constant 0 : i32
    %c0_i32_1 = arith.constant 0 : i32
    return %c0_i32, %c0_i32_0 : i32, i32
  }
  func.func @transform_2(%arg0: i32) -> (i32, i32) {
    %c0_i32 = arith.constant 0 : i32
    %c0_i32_0 = arith.constant 0 : i32
    %c0_i32_1 = arith.constant 0 : i32
    return %c0_i32, %c0_i32_0 : i32, i32
  }
  func.func @transform_3(%arg0: i32) -> (i32, i32) {
    %c0_i32 = arith.constant 0 : i32
    %c0_i32_0 = arith.constant 0 : i32
    %c0_i32_1 = arith.constant 0 : i32
    return %c0_i32, %c0_i32_0 : i32, i32
  }
  func.func @transform_4(%arg0: i32) -> (i32, i32) {
    %c0_i32 = arith.constant 0 : i32
    %c0_i32_0 = arith.constant 0 : i32
    %c0_i32_1 = arith.constant 0 : i32
    return %c0_i32, %c0_i32_0 : i32, i32
  }
  func.func @transform_5(%arg0: i32) -> (i32, i32) {
    %c0_i32 = arith.constant 0 : i32
    %c0_i32_0 = arith.constant 0 : i32
    %c0_i32_1 = arith.constant 0 : i32
    return %c0_i32, %c0_i32_0 : i32, i32
  }
  func.func @transform_6(%arg0: i32) -> (i32, i32) {
    %c0_i32 = arith.constant 0 : i32
    %c0_i32_0 = arith.constant 0 : i32
    %c0_i32_1 = arith.constant 0 : i32
    return %c0_i32, %c0_i32_0 : i32, i32
  }
  func.func @transform_7(%arg0: i32) -> (i32, i32) {
    %c0_i32 = arith.constant 0 : i32
    %c0_i32_0 = arith.constant 0 : i32
    return %arg0, %c0_i32 : i32, i32
  }
}

</mosaic_0001>

<bundles_post_ra>
// kernel: tpu_custom_call.1
= control target key start
LH: loop header
LB: loop body
LE: loop exit
PB: predicated region body
PF: predicated region fallthrough
CT: control target
= control target key end

     0   :  { %12 = vsyncpa [#allocation3], 0  ;;  %s660_s0 = inlined_call_operand.hbm [shape: f32[8,8], index: 0, kind: input, shape index: {}]   ;;  %s661_s1 = inlined_call_operand.hbm [shape: f32[8,32], index: 1, kind: input, shape index: {}]   ;;  %s662_s2 = inlined_call_operand.vmem [shape: f32[1,32], index: 2, kind: input, shape index: {}]   ;;  %s663_s3 = inlined_call_operand.hbm [shape: f32[32,32], index: 3, kind: input, shape index: {}]   ;;  %s664_s4 = inlined_call_operand.vmem [shape: f32[1,32], index: 4, kind: input, shape index: {}]   ;;  %s665_s5 = inlined_call_operand.hbm [shape: f32[32,128], index: 5, kind: input, shape index: {}]   ;;  %s666_s6 = inlined_call_operand.vmem [shape: f32[1,128], index: 6, kind: input, shape index: {}]   ;;  %s667_s7 = inlined_call_operand.hbm [shape: f32[8,128], index: 7, kind: output, shape index: {}]  }
   0x1   :  { %13 = vsyncpa [#allocation6], 0 }
   0x2   :  { %14 = vsyncpa [#allocation9], 0 }
   0x3   :  { %15 = vsyncpa [#allocation4], 0  ;;  %s541_s24 = smov [#allocation5]   ;;  %s542_s26 = smov [#allocation2]  }
   0x4   :  { %s32_s25 = sshll.u32 %s541_s24, 4  ;;  %s22_s27 = sshll.u32 %s542_s26, 4  ;;  %s33_s25 = int_to_ptr.vmem [resolvable:$true] %s32_s25  ;;  %s23_s27 = int_to_ptr.vmem [resolvable:$true] %s22_s27 }
   0x5   :  { %s423_s30 = scalar_lea.hbm %s661_s1, 128 }
   0x6   :  { %p424_p0 = scmp.ne.s32.totalorder %s661_s1, %s423_s30  ;;  %p427_p1 = scmp.lt.u32.totalorder %s423_s30, %s661_s1 }
   0x8   :  { %p429_p2 = pnand %p427_p1, %p424_p0 }
   0xa   :  { %432 = shalt.err (!%p429_p2)
}
   0xb   :  { %s433_s12 = scalar_lea.vmem %s33_s25, 128  ;;  %p438_p4 = scmp.lt.s32.totalorder %s33_s25, %s33_s25 }
   0xc   :  { %p434_p3 = scmp.ne.s32.totalorder %s33_s25, %s433_s12  ;;  %p439_p5 = scmp.lt.s32.totalorder %s433_s12, %s433_s12 }
   0xe   :  { %p440_p6 = por %p439_p5, %p438_p4 }
  0x10   :  { %p441_p7 = pnand %p440_p6, %p434_p3 }
  0x12   :  { %444 = shalt.err (!%p441_p7)
}
  0x13   :  { %35 = dma.hbm_to_vmem [thread:$0]  %s661_s1, 128, %s33_s25, [#allocation6]  }
  0x14   :  { %s445_s17 = scalar_lea.hbm %s660_s0, 128 }
  0x15   :  { %p446_p8 = scmp.ne.s32.totalorder %s660_s0, %s445_s17  ;;  %p449_p9 = scmp.lt.u32.totalorder %s445_s17, %s660_s0 }
  0x17   :  { %p451_p10 = pnand %p449_p9, %p446_p8 }
  0x19   :  { %454 = shalt.err (!%p451_p10)
}
  0x1a   :  { %s455_s22 = scalar_lea.vmem %s23_s27, 128  ;;  %p460_p12 = scmp.lt.s32.totalorder %s23_s27, %s23_s27 }
  0x1b   :  { %p456_p11 = scmp.ne.s32.totalorder %s23_s27, %s455_s22  ;;  %p461_p13 = scmp.lt.s32.totalorder %s455_s22, %s455_s22 }
  0x1d   :  { %p462_p0 = por %p461_p13, %p460_p12 }
  0x1f   :  { %p463_p1 = pnand %p462_p0, %p456_p11 }
  0x21   :  { %466 = shalt.err (!%p463_p1)
}
  0x22   :  { %25 = dma.hbm_to_vmem [thread:$0]  %s660_s0, 128, %s23_s27, [#allocation3]  }
  0x23   :  { %s543_s24 = smov [#allocation7]   ;;  %s467_s29 = scalar_lea.hbm %s663_s3, 512 }
  0x24   :  { %s43_s25 = sshll.u32 %s543_s24, 4  ;;  %p468_p2 = scmp.ne.s32.totalorder %s663_s3, %s467_s29  ;;  %s44_s25 = int_to_ptr.vmem [resolvable:$true] %s43_s25 }
  0x25   :  { %p471_p3 = scmp.lt.u32.totalorder %s467_s29, %s663_s3 }
  0x27   :  { %p473_p4 = pnand %p471_p3, %p468_p2 }
  0x29   :  { %476 = shalt.err (!%p473_p4)
}
  0x2a   :  { %s477_s11 = scalar_lea.vmem %s44_s25, 512  ;;  %p482_p6 = scmp.lt.s32.totalorder %s44_s25, %s44_s25 }
  0x2b   :  { %p478_p5 = scmp.ne.s32.totalorder %s44_s25, %s477_s11  ;;  %p483_p7 = scmp.lt.s32.totalorder %s477_s11, %s477_s11 }
  0x2d   :  { %p484_p8 = por %p483_p7, %p482_p6 }
  0x2f   :  { %p485_p9 = pnand %p484_p8, %p478_p5 }
  0x31   :  { %488 = shalt.err (!%p485_p9)
}
  0x32   :  { %s544_s0 = smov 128   ;;  %s545_s27 = smov 8  }
  0x33   :  { %49 = dma.hbm_to_vmem [thread:$0]  %s663_s3, 512, %s44_s25, [#allocation6], %s544_s0, %s544_s0, %s545_s27  }
  0x34   :  { %s546_s14 = smov [#allocation8]   ;;  %s489_s18 = scalar_lea.hbm %s665_s5, 512 }
  0x35   :  { %s57_s15 = sshll.u32 %s546_s14, 4  ;;  %p490_p10 = scmp.ne.s32.totalorder %s665_s5, %s489_s18  ;;  %s58_s15 = int_to_ptr.vmem [resolvable:$true] %s57_s15 }
  0x36   :  { %p493_p11 = scmp.lt.u32.totalorder %s489_s18, %s665_s5 }
  0x38   :  { %p495_p12 = pnand %p493_p11, %p490_p10 }
  0x3a   :  { %498 = shalt.err (!%p495_p12)
}
  0x3b   :  { %s499_s1 = scalar_lea.vmem %s58_s15, 512  ;;  %p504_p0 = scmp.lt.s32.totalorder %s58_s15, %s58_s15 }
  0x3c   :  { %p500_p13 = scmp.ne.s32.totalorder %s58_s15, %s499_s1  ;;  %p505_p1 = scmp.lt.s32.totalorder %s499_s1, %s499_s1 }
  0x3e   :  { %p506_p2 = por %p505_p1, %p504_p0 }
  0x40   :  { %p507_p3 = pnand %p506_p2, %p500_p13 }
  0x42   :  { %510 = shalt.err (!%p507_p3)
}
  0x43   :  { %63 = dma.hbm_to_vmem [thread:$0]  %s665_s5, 512, %s58_s15, [#allocation9], %s544_s0, %s544_s0, %s545_s27  }
  0x44   :  { %533 = dma.done.wait [#allocation3], 128  }
  0x45   :  { %534 = vsyncadd [#allocation3], 4294967168 }
  0x46   :  { %535 = dma.done.wait [#allocation6], 640  }
  0x47   :  { %536 = vsyncadd [#allocation6], 4294966656 }
  0x48   :  { %537 = dma.done.wait [#allocation9], 512  }
  0x49   :  { %538 = vsyncadd [#allocation9], 4294966784  ;;  %v547_v0 = vmov 0.0   ;;  %vm548_vm0 = vmmov 0   ;;  %v549_v1 = vmov 0.0|0.0   ;;  %vm87_vm1 = vcmask 64512  }
  0x4a   :  { %374 = vmatprep.subr.mxu0 %v547_v0  ;;  %376 = vmatprep.mubr.msk.f32.mxu0 %vm548_vm0, %v547_v0  ;;  %v79_v2 = vld [vmem:[#allocation5] sm:$0xff]  ;;  %v78_v3 = vld [vmem:[#allocation2] sm:$0xff]  ;;  %v162_v4 = vld [vmem:[#allocation7] sm:$0xff]  ;;  %vm173_vm2 = vcmask 261120   ;;  %v332_v26 = vlaneseq  ;;  %s550_s29 = smov [#allocation10]  }
  0x4b   :  { %401 = vmatprep.subr.bf16.mxu1 %v549_v1  ;;  %387 = vmatprep.mubr.msk.f32.mxu1 %vm548_vm0, %v547_v0  ;;  %v163_v5 = vld [vmem:[#allocation7 + $0x8] sm:$0xff]  ;;  %v164_v7 = vld [vmem:[#allocation7 + $0x10] sm:$0xff]  ;;  %v165_v8 = vld [vmem:[#allocation7 + $0x18] sm:$0xff]  ;;  %s345_s30 = sshll.u32 %s550_s29, 4  ;;  %s346_s30 = int_to_ptr.vmem [resolvable:$true] %s345_s30 }
  0x4c   :  { %375 = vmatpush3.msra.mxu0 %v79_v2  ;;  %v402_v6 = vpack.c.bf16 %v163_v5, %v162_v4  ;;  %v405_v9 = vpack.c.bf16 %v165_v8, %v164_v7  ;;  %v248_v10 = vld [vmem:[#allocation8] sm:$0xff]  ;;  %v249_v11 = vld [vmem:[#allocation8 + $0x8] sm:$0xff]  ;;  %v356_v13 = vld [vmem:[%s662_s2] ss:$0 sm:$0xff]  ;;  %v333_v29 = vand.u32 127, %v332_v26  ;;  %p516_p5 = scmp.lt.s32.totalorder %s346_s30, %s346_s30 }
  0x4d   :  { %377 = vmatmul.mubr.msk.f32.vlgmr.msra.gmra.mrb[0].mxu0 %vm87_vm1, %v78_v3  ;;  %407 = vmatprep.subr.bf16.mxu0 %v549_v1  ;;  %v408_v12 = vpack.c.bf16 %v249_v11, %v248_v10  ;;  %v250_v18 = vld [vmem:[#allocation8 + $0x10] sm:$0xff]  ;;  %v251_v19 = vld [vmem:[#allocation8 + $0x18] sm:$0xff] }
  0x4e   :  { %398 = vmatprep.mubr.msk.f32.mxu0 %vm548_vm0, %v547_v0  ;;  %403 = vmatpush3.bf16.msra.mxu1 %v402_v6  ;;  %v411_v20 = vpack.c.bf16 %v251_v19, %v250_v18  ;;  %v358_v21 = vld [vmem:[%s664_s4] ss:$0 sm:$0xff]  ;;  %vm336_vm3 = vcmp.eq.s32.totalorder %v333_v29, 1  ;;  %s511_s4 = scalar_lea.vmem %s346_s30, 128 }
  0x4f   :  { %404 = vmatprep.subr.bf16.mxu1 %v549_v1  ;;  %409 = vmatpush3.bf16.msra.mxu0 %v408_v12  ;;  %v360_v27 = vld [vmem:[%s666_s6] ss:$0 sm:$0xff]  ;;  %p512_p4 = scmp.ne.s32.totalorder %s346_s30, %s511_s4  ;;  %p517_p6 = scmp.lt.s32.totalorder %s511_s4, %s511_s4 }
  0x50   :  { %410 = vmatprep.subr.bf16.mxu0 %v549_v1 }
  0x51   :  { %p518_p7 = por %p517_p6, %p516_p5 }
  0x52   :  { %406 = vmatpush3.bf16.msra.mxu1 %v405_v9 }
  0x53   :  { %412 = vmatpush3.bf16.msra.mxu0 %v411_v20  ;;  %p519_p8 = pnand %p518_p7, %p512_p4 }
 0x120   :  { %v157_v14 = vpop.f32.mrb[0].mxu0 }
 0x121   :  { %v158_v15 = vadd.f32 %v356_v13, %v157_v14  ;;  %v378_v16 = vpop.f32.mrb[1].mxu0 }
 0x123   :  { %v161_v17 = vmax.f32 %v158_v15, 0.0 }
 0x125   :  { %388 = vmatmul.mubr.msk.f32.vlgmr.msra.gmra.mrb[0].mxu1 %vm173_vm2, %v161_v17 }
 0x1f8   :  { %v243_v22 = vpop.f32.mrb[0].mxu1 }
 0x1f9   :  { %v244_v23 = vadd.f32 %v358_v21, %v243_v22  ;;  %v389_v24 = vpop.f32.mrb[1].mxu1 }
 0x1fb   :  { %v247_v25 = vmax.f32 %v244_v23, 0.0 }
 0x1fd   :  { %399 = vmatmul.mubr.msk.f32.vlgmr.msra.gmra.mrb[2].mxu0 %vm173_vm2, %v247_v25 }
 0x2d0   :  { %v328_v28 = vpop.f32.mrb[2].mxu0 }
 0x2d1   :  { %v329_v30 = vadd.f32 %v360_v27, %v328_v28  ;;  %v400_v31 = vpop.f32.mrb[3].mxu0 }
 0x2d3   :  { %v334_v32 = vmax.f32 %v329_v30, 1e-06 }
 0x2d5   :  { %v335_v33 = vmin.f32 %v334_v32, 2.0 }
 0x2d7   :  { %v337_v34 = vsel %vm336_vm3, %v335_v33, %v329_v30 }
 0x2d8   :  { %338 = vst [vmem:[#allocation10] sm:$0xff] %v337_v34 }
 0x2d9   :  { %522 = shalt.err (!%p519_p8)
}
 0x2da   :  { %s523_s9 = scalar_lea.hbm %s667_s7, 128 }
 0x2db   :  { %p524_p9 = scmp.ne.s32.totalorder %s667_s7, %s523_s9  ;;  %p527_p10 = scmp.lt.u32.totalorder %s523_s9, %s667_s7 }
 0x2dd   :  { %p529_p11 = pnand %p527_p10, %p524_p9 }
 0x2df   :  { %532 = shalt.err (!%p529_p11)
}
 0x2e0   :  { %348 = dma.vmem_to_hbm [thread:$0]  %s346_s30, 128, %s667_s7, [#allocation4]  }
 0x2e1   :  { %539 = dma.done.wait [#allocation4], 128  }
 0x2e2   :  { %540 = vsyncadd [#allocation4], 4294967168 }
 0x2e3   :  { %352 = vsyncpa [#allocation3], 1 }
 0x2e4   :  { %353 = vsyncpa [#allocation6], 1 }
 0x2e5   :  { %354 = vsyncpa [#allocation9], 1 }
 0x2e6   :  { %355 = vsyncpa [#allocation4], 1 }

</bundles_post_ra>
